<compile_context>
chip_gen: v7x
topology: tpu7x:2x2x1
jax: 0.10.0
libtpu: 0.0.40
codegen_flags: <defaults>
</compile_context>

<pallas_src>
import functools

import jax
import jax.numpy as jnp
from jax.experimental import pallas as pl
from jax.experimental.pallas import tpu as pltpu


# ---------------------------------------------------------------------------
# Bilinear (align_corners=False, no antialias) interpolation matrix — PyTorch formula.
# ---------------------------------------------------------------------------
def _bilinear_interp_matrix(in_size, out_size):
    """Returns M (out_size, in_size) with  y = M @ x  ==  F.interpolate(x, bilinear)."""
    scale = in_size / out_size
    pos = (jnp.arange(out_size, dtype=jnp.float32) + 0.5) * scale - 0.5
    pos = jnp.maximum(pos, 0.0)                              # PyTorch clamps src >= 0
    i0 = jnp.minimum(jnp.floor(pos).astype(jnp.int32), in_size - 1)
    i1 = jnp.minimum(i0 + 1, in_size - 1)
    frac = pos - i0.astype(jnp.float32)
    rows = jnp.arange(out_size)
    m = jnp.zeros((out_size, in_size), jnp.float32)
    m = m.at[rows, i0].add(1.0 - frac)                       # .add handles i0 == i1
    m = m.at[rows, i1].add(frac)
    return m


# ---------------------------------------------------------------------------
# Pallas kernel: one batch element per grid step, everything resident in VMEM.
# ---------------------------------------------------------------------------
def _upsample_kernel(x_ref, ah_ref, awt_ref, wc_ref, bc_ref, o_ref, *, c, h, ho, wo):
    xb = x_ref[0].astype(jnp.float32)                        # (C*H, W)

    # Width interpolation: one flat MXU matmul over all (channel, row) pairs.
    zw = jnp.dot(xb, awt_ref[...],
                 preferred_element_type=jnp.float32)         # (C*H, Wo)
    zw = zw.reshape(c, h, wo)                                # leading-dim split (layout-free)

    # Height interpolation: batched-over-channel MXU matmul  (C, Ho, H) x (C, H, Wo).
    zh = jnp.einsum("coh,chw->cow", ah_ref[...], zw,
                    preferred_element_type=jnp.float32)      # (C, Ho, Wo)

    # 1x1 conv over channels (+ bias), as a plain 2-D matmul; lane-dense output slab.
    zh = zh.reshape(c, ho * wo)                              # (C, Ho*Wo)
    out = jnp.dot(wc_ref[...], zh,
                  preferred_element_type=jnp.float32) + bc_ref[...]   # (Co, Ho*Wo)

    o_ref[0] = out.astype(o_ref.dtype)


# ---------------------------------------------------------------------------
# Wrapper: parameter plumbing + pallas_call
# ---------------------------------------------------------------------------
def upsample_ratio(x, w_conv, b_conv, *, ratio):
    n, c, h, w = x.shape
    ho, wo = int(h * ratio), int(w * ratio)
    co = w_conv.shape[0]

    # Small separable interpolation matrices (O(H)/O(W) sized). Only A_h is broadcast
    # over channels (for the batched matmul); A_w^T stays 2-D for the flat matmul.
    a_h = _bilinear_interp_matrix(h, ho)                     # (Ho, H)
    a_wt = _bilinear_interp_matrix(w, wo).T                  # (W, Wo)
    a_h_b = jnp.broadcast_to(a_h[None], (c, ho, h))          # (C, Ho, H)
    bc = b_conv.reshape(co, 1)                               # (Co, 1)

    # Free row-major view: rows = (channel, height) pairs -> flat width-interp matmul.
    x_rows = x.reshape(n, c * h, w)                          # (N, C*H, W)

    kernel = functools.partial(_upsample_kernel, c=c, h=h, ho=ho, wo=wo)

    out_flat = pl.pallas_call(
        kernel,
        out_shape=jax.ShapeDtypeStruct((n, co, ho * wo), x.dtype),
        grid_spec=pltpu.PrefetchScalarGridSpec(
            num_scalar_prefetch=0,
            grid=(n,),                                       # batch -> parallel grid steps
            in_specs=[
                pl.BlockSpec((1, c * h, w), lambda b: (b, 0, 0)),   # x rows
                pl.BlockSpec((c, ho, h), lambda b: (0, 0, 0)),      # A_h (bcast over C)
                pl.BlockSpec((w, wo), lambda b: (0, 0)),            # A_w^T
                pl.BlockSpec((co, c), lambda b: (0, 0)),            # conv weight
                pl.BlockSpec((co, 1), lambda b: (0, 0)),            # conv bias
            ],
            out_specs=pl.BlockSpec((1, co, ho * wo), lambda b: (b, 0, 0)),
        ),
        compiler_params=pltpu.CompilerParams(
            dimension_semantics=("parallel",),
            vmem_limit_bytes=32 * 1024 * 1024,
        ),
    )(x_rows, a_h_b, a_wt, w_conv, bc)

    return out_flat.reshape(n, co, ho, wo)                   # NCHW


# ---------------------------------------------------------------------------
# Pure-JAX reference (faithful transcription of F.interpolate bilinear + 1x1 conv)
# ---------------------------------------------------------------------------
def reference_forward(x, w_conv, b_conv, *, ratio):
    n, c, h, w = x.shape
    ho, wo = int(h * ratio), int(w * ratio)

    def src_index(in_size, out_size):
        scale = in_size / out_size
        pos = (jnp.arange(out_size, dtype=jnp.float32) + 0.5) * scale - 0.5
        pos = jnp.maximum(pos, 0.0)
        i0 = jnp.minimum(jnp.floor(pos).astype(jnp.int32), in_size - 1)
        i1 = jnp.minimum(i0 + 1, in_size - 1)
        frac = pos - i0.astype(jnp.float32)
        return i0, i1, frac

    h0, h1, hf = src_index(h, ho)
    w0, w1, wf = src_index(w, wo)

    top = (x[:, :, h0, :] * (1.0 - hf)[None, None, :, None]
           + x[:, :, h1, :] * hf[None, None, :, None])               # (N, C, Ho, W)
    y = top[:, :, :, w0] * (1.0 - wf) + top[:, :, :, w1] * wf        # (N, C, Ho, Wo)

    out = jnp.einsum("kc,nchw->nkhw", w_conv, y) + b_conv[None, :, None, None]
    return out


if __name__ == "__main__":
    features = 4                 # C (module: features)
    ratio = 0.5                  # "UpSampleRatio_1_2" -> spatial ratio 1/2
    N, H, W = 2, 16, 16

    key = jax.random.PRNGKey(0)
    kx, kw, kb = jax.random.split(key, 3)
    x = jax.random.normal(kx, (N, features, H, W), jnp.float32)

    co = features // 2
    bound = 1.0 / (features ** 0.5)                          # Conv2d default init bound
    w_conv = jax.random.uniform(kw, (co, features), jnp.float32, -bound, bound)
    b_conv = jax.random.uniform(kb, (co,), jnp.float32, -bound, bound)

    out = upsample_ratio(x, w_conv, b_conv, ratio=ratio)
    out = jax.block_until_ready(out)

    ref = reference_forward(x, w_conv, b_conv, ratio=ratio)
    assert out.shape == ref.shape == (N, co, int(H * ratio), int(W * ratio))
    err = jnp.max(jnp.abs(out - ref))
    assert jnp.allclose(out, ref, atol=1e-4, rtol=1e-4), f"max abs err = {err}"

    print("KERNEL_OK")
</pallas_src>

<mosaic_0001>
module attributes {stable_mosaic.version = 11 : i64} {
  func.func @_upsample_kernel(%arg0: i32, %arg1: memref<1x64x16xf32, #tpu.memory_space<vmem>>, %arg2: memref<4x8x16xf32, #tpu.memory_space<vmem>>, %arg3: memref<16x8xf32, #tpu.memory_space<vmem>>, %arg4: memref<2x4xf32, #tpu.memory_space<vmem>>, %arg5: memref<2x1xf32, #tpu.memory_space<vmem>>, %arg6: memref<1x2x64xf32, #tpu.memory_space<vmem>>) attributes {dimension_semantics = [#tpu.dimension_semantics<parallel>], iteration_bounds = array<i64: 2>, scalar_prefetch = 0 : i64, scratch_operands = 0 : i64, tpu.core_type = #tpu.core_type<tc>, window_params = [{transform_indices = @transform_0, window_bounds = array<i64: 1, 64, 16>}, {pipeline_mode = #tpu.pipeline_mode<synchronous>, transform_indices = @transform_1, window_bounds = array<i64: 4, 8, 16>}, {pipeline_mode = #tpu.pipeline_mode<synchronous>, transform_indices = @transform_2, window_bounds = array<i64: 16, 8>}, {pipeline_mode = #tpu.pipeline_mode<synchronous>, transform_indices = @transform_3, window_bounds = array<i64: 2, 4>}, {pipeline_mode = #tpu.pipeline_mode<synchronous>, transform_indices = @transform_4, window_bounds = array<i64: 2, 1>}, {transform_indices = @transform_5, window_bounds = array<i64: 1, 2, 64>}]} {
    %c0 = arith.constant 0 : index
    %c0_0 = arith.constant 0 : index
    %c0_1 = arith.constant 0 : index
    %0 = vector.load %arg1[%c0, %c0_0, %c0_1] : memref<1x64x16xf32, #tpu.memory_space<vmem>>, vector<1x64x16xf32>
    %1 = vector.shape_cast %0 : vector<1x64x16xf32> to vector<64x16xf32>
    %c0_2 = arith.constant 0 : index
    %c0_3 = arith.constant 0 : index
    %2 = vector.load %arg3[%c0_2, %c0_3] : memref<16x8xf32, #tpu.memory_space<vmem>>, vector<16x8xf32>
    %cst = arith.constant dense<0.000000e+00> : vector<64x8xf32>
    %3 = tpu.matmul %1, %2, %cst {dimension_numbers = #tpu.dot_dimension_numbers<[1], [0], [0], [1], [0, 0, 1, 1], [], []>} : vector<64x16xf32>, vector<16x8xf32>, vector<64x8xf32> -> vector<64x8xf32>
    %4 = vector.shape_cast %3 : vector<64x8xf32> to vector<4x16x8xf32>
    %c0_4 = arith.constant 0 : index
    %c0_5 = arith.constant 0 : index
    %c0_6 = arith.constant 0 : index
    %5 = vector.load %arg2[%c0_4, %c0_5, %c0_6] : memref<4x8x16xf32, #tpu.memory_space<vmem>>, vector<4x8x16xf32>
    "tpu.trace_start"() <{level = 10 : i32, message = "coh,chw->cow"}> : () -> ()
    %cst_7 = arith.constant dense<0.000000e+00> : vector<4x8x8xf32>
    %6 = tpu.matmul %5, %4, %cst_7 {dimension_numbers = #tpu.dot_dimension_numbers<[2], [1], [1], [2], [0, 0, 0, 1, 1, 2], [0], [0]>} : vector<4x8x16xf32>, vector<4x16x8xf32>, vector<4x8x8xf32> -> vector<4x8x8xf32>
    "tpu.trace_stop"() : () -> ()
    %7 = vector.shape_cast %6 : vector<4x8x8xf32> to vector<4x64xf32>
    %c0_8 = arith.constant 0 : index
    %c0_9 = arith.constant 0 : index
    %8 = vector.load %arg4[%c0_8, %c0_9] : memref<2x4xf32, #tpu.memory_space<vmem>>, vector<2x4xf32>
    %cst_10 = arith.constant dense<0.000000e+00> : vector<2x64xf32>
    %9 = tpu.matmul %8, %7, %cst_10 {dimension_numbers = #tpu.dot_dimension_numbers<[1], [0], [0], [1], [0, 0, 1, 1], [], []>} : vector<2x4xf32>, vector<4x64xf32>, vector<2x64xf32> -> vector<2x64xf32>
    %c0_11 = arith.constant 0 : index
    %c0_12 = arith.constant 0 : index
    %10 = vector.load %arg5[%c0_11, %c0_12] : memref<2x1xf32, #tpu.memory_space<vmem>>, vector<2x1xf32>
    %11 = vector.broadcast %10 : vector<2x1xf32> to vector<2x64xf32>
    %12 = arith.addf %9, %11 : vector<2x64xf32>
    %c0_13 = arith.constant 0 : index
    %c0_14 = arith.constant 0 : index
    %c0_15 = arith.constant 0 : index
    %13 = vector.load %arg6[%c0_13, %c0_14, %c0_15] : memref<1x2x64xf32, #tpu.memory_space<vmem>>, vector<1x2x64xf32>
    %14 = vector.shape_cast %13 : vector<1x2x64xf32> to vector<2x64xf32>
    %15 = vector.shape_cast %12 : vector<2x64xf32> to vector<1x2x64xf32>
    tpu.vector_store %arg6[%c0_13, %c0_14, %c0_15], %15 {strides = array<i32>} : memref<1x2x64xf32, #tpu.memory_space<vmem>>, vector<1x2x64xf32>,
    return
  }
  func.func @transform_0(%arg0: i32) -> (i32, i32, i32) {
    %c0_i32 = arith.constant 0 : i32
    %c0_i32_0 = arith.constant 0 : i32
    %c0_i32_1 = arith.constant 0 : i32
    return %arg0, %c0_i32, %c0_i32_0 : i32, i32, i32
  }
  func.func @transform_1(%arg0: i32) -> (i32, i32, i32) {
    %c0_i32 = arith.constant 0 : i32
    %c0_i32_0 = arith.constant 0 : i32
    %c0_i32_1 = arith.constant 0 : i32
    %c0_i32_2 = arith.constant 0 : i32
    return %c0_i32, %c0_i32_0, %c0_i32_1 : i32, i32, i32
  }
  func.func @transform_2(%arg0: i32) -> (i32, i32) {
    %c0_i32 = arith.constant 0 : i32
    %c0_i32_0 = arith.constant 0 : i32
    %c0_i32_1 = arith.constant 0 : i32
    return %c0_i32, %c0_i32_0 : i32, i32
  }
  func.func @transform_3(%arg0: i32) -> (i32, i32) {
    %c0_i32 = arith.constant 0 : i32
    %c0_i32_0 = arith.constant 0 : i32
    %c0_i32_1 = arith.constant 0 : i32
    return %c0_i32, %c0_i32_0 : i32, i32
  }
  func.func @transform_4(%arg0: i32) -> (i32, i32) {
    %c0_i32 = arith.constant 0 : i32
    %c0_i32_0 = arith.constant 0 : i32
    %c0_i32_1 = arith.constant 0 : i32
    return %c0_i32, %c0_i32_0 : i32, i32
  }
  func.func @transform_5(%arg0: i32) -> (i32, i32, i32) {
    %c0_i32 = arith.constant 0 : i32
    %c0_i32_0 = arith.constant 0 : i32
    %c0_i32_1 = arith.constant 0 : i32
    return %arg0, %c0_i32, %c0_i32_0 : i32, i32, i32
  }
}

</mosaic_0001>

<bundles_post_ra>
// kernel: tpu_custom_call.1
= control target key start
LH: loop header
LB: loop body
LE: loop exit
PB: predicated region body
PF: predicated region fallthrough
CT: control target
= control target key end

     0   :  { %10 = vsyncpa [#allocation3], 0  ;;  %s1357_s0 = inlined_call_operand.vmem [shape: f32[2,64,16], index: 0, kind: input, shape index: {}]   ;;  %s1358_s1 = inlined_call_operand.vmem [shape: f32[4,8,16], index: 1, kind: input, shape index: {}]   ;;  %s1359_s2 = inlined_call_operand.vmem [shape: f32[16,8], index: 2, kind: input, shape index: {}]   ;;  %s1360_s3 = inlined_call_operand.vmem [shape: f32[2,4], index: 3, kind: input, shape index: {}]   ;;  %s1361_s4 = inlined_call_operand.vmem [shape: f32[2,1], index: 4, kind: input, shape index: {}]   ;;  %s1362_s5 = inlined_call_operand.hbm [shape: f32[2,2,64], index: 5, kind: output, shape index: {}]  }
   0x1   :  { %12 = vsyncpa [#allocation3 + $0x1], 0  ;;  %s1205_s18 = smov 0   ;;  %s1207_s19 = smov 0  }
   0x2   :  { %s1209_s20 = smov 0   ;;  %s1211_s21 = smov 0  }
   0x3 LB: > { %s1226_s22 = sadd.s32 4294967295, %s1159_s21   ;;  %s928_s23 = sadd.s32 4294967294, %s1159_s21   ;;  %s1159_s21 = sphi %s1211_s21, %s1368_s21   ;;  %s1155_s20 = sphi %s1209_s20, %s1367_s20   ;;  %s1151_s19 = sphi %s1207_s19, %s1366_s19   ;;  %s1147_s18 = sphi %s1205_s18, %s1365_s18  }
   0x4   : > { %s1230_s24 = sadd.s32 1, %s1159_s21   ;;  %s135_s25 = sadd.s32 1, %s1155_s20 }
   0x5   : > { %s132_s26 = ssub.s32 %s1159_s21, %s1230_s24  ;;  %p145_p0 = scmp.ne.s32.totalorder %s1155_s20, %s1151_s19 }
   0x6   : > { %p133_p1 = scmp.eq.s32.totalorder %s132_s26, 0  ;;  %p146_p2 = scmp.eq.s32.totalorder %s1226_s22, 1 }
   0x7   : > { %p151_p3 = scmp.ne.s32.totalorder %s1151_s19, %s1147_s18  ;;  %p152_p4 = scmp.eq.s32.totalorder %s928_s23, 1 }
   0x8   : > { %s1241_s27 = scalar_select %p133_p1, %s1155_s20, %s135_s25  }
   0x9   : > { %p1243_p5 = por %p146_p2, %p145_p0  ;;  %p1247_p6 = por %p152_p4, %p151_p3 }
   0xa   : > { %p931_p7 = scmp.ge.s32.totalorder %s1159_s21, 1  ;;  %p190_p8 = scmp.lt.s32.totalorder %s1159_s21, 3 }
   0xc   : > { %p191_p9 = pnand %p931_p7, %p190_p8 }
   0xd   : > { %v231_v0 = vld [vmem:[%s1359_s2] sm:$0xff] (!%p191_p9)  ;;  %v232_v1 = vld [vmem:[%s1359_s2 + $0x8] sm:$0xff] (!%p191_p9)  ;;  %p218_p10 = scmp.lt.s32.totalorder (!%p191_p9), %s1226_s22, 1  ;;  %vm233_vm0 = vcmask (!%p191_p9), 130048   ;;  %v1161_v11 = vmov (!%p191_p9), 0.0|0.0   ;;  %vm1162_vm1 = vmmov (!%p191_p9), 0   ;;  %v664_v33 = vlaneseq (!%p191_p9) }
   0xe   : > { %194 = sbr.rel (%p191_p9) target bundleno = 834 (0x342), region = 40  ;;  %v1027_v2 = vpack.c.bf16 (!%p191_p9), %v232_v1, %v231_v0  ;;  %1031 = vmatprep.subr.bf16.mxu1 (!%p191_p9), %v1161_v11  ;;  %v1163_v12 = vmov (!%p191_p9), 0.0   ;;  %v363_v17 = vld [vmem:[%s1358_s1] sm:$0xff] (!%p191_p9)  ;;  %v364_v21 = vld [vmem:[%s1358_s1 + $0x8] sm:$0xff] (!%p191_p9)  ;;  %v365_v25 = vld [vmem:[%s1358_s1 + $0x10] sm:$0xff] (!%p191_p9)  ;;  %s1166_s6 = smov (!%p191_p9), 32  }
   0xf   : > { %998 = vmatprep.mubr.msk.f32.mxu1 (!%p191_p9), %vm1162_vm1, %v1163_v12  ;;  %v366_v28 = vld [vmem:[%s1358_s1 + $0x18] sm:$0xff] (!%p191_p9)  ;;  %v1164_v31 = vmov (!%p191_p9), 1983009808   ;;  %v1165_v36 = vmov (!%p191_p9), 1934713408   ;;  %v665_v39 = vshrl.u32 (!%p191_p9), %v664_v33, 7 }
  0x10   : > { %1028 = vmatprep.subr.bf16.mxu0 (!%p191_p9), %v1027_v2  ;;  %v662_v32 = vunpack.c.l.s4 (!%p191_p9), %v1164_v31  ;;  %v694_v37 = vunpack.c.l.s4 (!%p191_p9), %v1165_v36  ;;  %s1167_s7 = smov (!%p191_p9), 16   ;;  %v1168_v0 = vmov (!%p191_p9), 0   ;;  %s1169_s8 = smov (!%p191_p9), 24   ;;  %vm755_vm2 = vcmask (!%p191_p9), 64512  }
  0x11   : > { %1030 = vmatpush3.bf16.msra.mxu0 (!%p191_p9), %v1027_v2  ;;  %1095 = vset.pattern.permute.xlu1 (!%p191_p9), %v1168_v0  ;;  %s1172_s11 = smov (!%p191_p9), 40   ;;  %s1173_s14 = smov (!%p191_p9), 56   ;;  %vm758_vm3 = vcmask (!%p191_p9), 195584   ;;  %vm760_vm4 = vcmask (!%p191_p9), 261120   ;;  %vm762_vm5 = vcmask (!%p191_p9), 326656   ;;  %vm764_vm6 = vcmask (!%p191_p9), 392192  }
  0x12   : > { %1022 = vmatprep.subr.mxu0 (!%p191_p9), %v1163_v12  ;;  %v663_v38 = vunpack.c.0.s8 (!%p191_p9), %v662_v32  ;;  %v695_v44 = vunpack.c.0.s8 (!%p191_p9), %v694_v37  ;;  %1096 = vset.pattern.permute.xlu0 (!%p191_p9), %v1168_v0  ;;  %vm766_vm7 = vcmask (!%p191_p9), 457728   ;;  %vm779_vm8 = vcmask (!%p191_p9), 1043456   ;;  %s215_s17 = sand.u32 (!%p191_p9), 1, %s1151_s19   ;;  %s950_s25 = sshll.u32 (!%p191_p9), %s1226_s22, 5 }
  0x13   : > { %vm775_vm9 = vcmask (!%p191_p9), 31744   ;;  %s932_s23 = sshll.u32 (!%p191_p9), %s215_s17, 1  ;;  %vm853_vm10 = vcmask (!%p191_p9), 517120  }
  0x14   : > { %v666_v45 = vsub.s32 (!%p191_p9), %v663_v38, %v665_v39  ;;  %v698_v50 = vsub.s32 (!%p191_p9), %v695_v44, %v665_v39  ;;  %s217_s26 = scalar_lea.vmem (!%p191_p9), [#allocation2], %s932_s23 }
  0x15   : > { %s219_s9 = scalar_select %p218_p10, %s1226_s22, 1 }
  0x16   : > { %s869_s30 = sshll.u32 %s217_s26, 4  ;;  %s1174_s22 = smov [#allocation2]   ;;  %s1317_s30 = int_to_ptr.vmem [resolvable:$true] %s869_s30 }
  0x17   : > { %s953_s10 = sshll.u32 %s219_s9, 6  ;;  %s1170_s9 = smov 8  }
  0x18   : > { %s222_s13 = scalar_lea.vmem %s1357_s0, %s953_s10  ;;  %s1171_s10 = smov 48  }
  0x19   : > { %v223_v3 = vld [vmem:[%s222_s13] sm:$0xff]  ;;  %v224_v4 = vld [vmem:[%s222_s13 + $0x8] sm:$0xff]  ;;  %v225_v5 = vld [vmem:[%s222_s13 + $0x10] sm:$0xff] }
  0x1a   : > { %982 = vmatprep.mubr.msk.f32.mxu0 %vm233_vm0, %v223_v3  ;;  %v226_v6 = vld [vmem:[%s222_s13 + $0x18] sm:$0xff]  ;;  %v227_v7 = vld [vmem:[%s222_s13 + $0x20] sm:$0xff]  ;;  %v228_v8 = vld [vmem:[%s222_s13 + $0x28] sm:$0xff] }
  0x1b   : > { %983 = vmatmul.mubr.msk.f32.vlgmr.msra.gmra.mrb[0].mxu0 %vm233_vm0, %v224_v4  ;;  %v229_v9 = vld [vmem:[%s222_s13 + $0x30] sm:$0xff]  ;;  %v230_v10 = vld [vmem:[%s222_s13 + $0x38] sm:$0xff]  ;;  %v769_v3 = vld [vmem:[%s1361_s4] sm:$0x3] }
  0x1c   : > { %985 = vmatprep.mubr.msk.f32.mxu0 %vm233_vm0, %v225_v5 }
  0x1f   : > { %986 = vmatmul.mubr.msk.f32.gmra.mrb[2].mxu0 %vm233_vm0, %v226_v6 }
  0x20   : > { %988 = vmatprep.mubr.msk.f32.mxu0 %vm233_vm0, %v227_v7 }
  0x23   : > { %989 = vmatmul.mubr.msk.f32.gmra.mrb[4].mxu0 %vm233_vm0, %v228_v8 }
  0x24   : > { %991 = vmatprep.mubr.msk.f32.mxu0 %vm233_vm0, %v229_v9 }
  0x27   : > { %992 = vmatmul.mubr.msk.f32.gmra.mrb[6].mxu0 %vm233_vm0, %v230_v10 }
  0x28   : > { %1024 = vmatprep.mubr.msk.f32.mxu0 %vm1162_vm1, %v1163_v12 }
  0xee   : > { %v984_v13 = vpop.f32.mrb[0].mxu0 }
  0xef   : > { %v324_v14 = vpop.f32.mrb[1].mxu0 }
  0xf0   : > { %v1032_v15 = vpack.c.bf16 %v984_v13, %v324_v14 }
  0xf2   : > { %v987_v16 = vpop.f32.mrb[2].mxu0  ;;  %1033 = vmatpush3.bf16.msra.mxu1 %v1032_v15 }
  0xf3   : > { %v334_v18 = vpop.f32.mrb[3].mxu0  ;;  %1034 = vmatprep.subr.bf16.mxu1 %v1161_v11 }
  0xf4   : > { %v1035_v19 = vpack.c.bf16 %v987_v16, %v334_v18  ;;  %v768_v18 = vld [vmem:[%s1360_s3] sm:$0x3] }
  0xf5   : > { %999 = vmatmul.mubr.msk.f32.vlgmr.msra.gmra.mrb[0].mxu1 %vm233_vm0, %v363_v17 }
  0xf6   : > { %v990_v20 = vpop.f32.mrb[4].mxu0  ;;  %1036 = vmatpush3.bf16.msra.mxu1 %v1035_v19  ;;  %1005 = vmatprep.mubr.msk.f32.mxu1 %vm1162_vm1, %v1163_v12 }
  0xf7   : > { %v344_v22 = vpop.f32.mrb[5].mxu0  ;;  %1037 = vmatprep.subr.bf16.mxu1 %v1161_v11 }
  0xf8   : > { %v1038_v23 = vpack.c.bf16 %v990_v20, %v344_v22 }
  0xf9   : > { %1006 = vmatmul.mubr.msk.f32.vlgmr.msra.gmra.mrb[2].mxu1 %vm233_vm0, %v364_v21 }
  0xfa   : > { %v993_v24 = vpop.f32.mrb[6].mxu0  ;;  %1039 = vmatpush3.bf16.msra.mxu1 %v1038_v23  ;;  %1012 = vmatprep.mubr.msk.f32.mxu1 %vm1162_vm1, %v1163_v12 }
  0xfb   : > { %v354_v26 = vpop.f32.mrb[7].mxu0  ;;  %1040 = vmatprep.subr.bf16.mxu1 %v1161_v11 }
  0xfc   : > { %v1041_v27 = vpack.c.bf16 %v993_v24, %v354_v26 }
  0xfd   : > { %1013 = vmatmul.mubr.msk.f32.vlgmr.msra.gmra.mrb[4].mxu1 %vm233_vm0, %v365_v25 }
  0xfe   : > { %1042 = vmatpush3.bf16.msra.mxu1 %v1041_v27  ;;  %1019 = vmatprep.mubr.msk.f32.mxu1 %vm1162_vm1, %v1163_v12 }
 0x101   : > { %1020 = vmatmul.mubr.msk.f32.vlgmr.msra.gmra.mrb[6].mxu1 %vm233_vm0, %v366_v28 }
 0x1c8   : > { %v436_v29 = vpop.f32.mrb[0].mxu1 }
 0x1c9   : > { %v1000_v30 = vpop.f32.mrb[1].mxu1 }
 0x1cc   : > { %v509_v34 = vpop.f32.mrb[2].mxu1 }
 0x1cd   : > { %v1007_v35 = vpop.f32.mrb[3].mxu1 }
 0x1d0   : > { %v582_v40 = vpop.f32.mrb[4].mxu1 }
 0x1d1   : > { %v659_v41 = vcombine.low %v436_v29, %v582_v40  ;;  %v660_v42 = vcombine.high %v436_v29, %v582_v40  ;;  %v1014_v43 = vpop.f32.mrb[5].mxu1 }
 0x1d3   : > { %v667_v51 = vrot.slane %v659_v41, %v666_v45  ;;  %v674_v52 = vrot.slane %v660_v42, %v666_v45 }
 0x1d4   : > { %v655_v46 = vpop.f32.mrb[6].mxu1 }
 0x1d5   : > { %v675_v47 = vcombine.low %v509_v34, %v655_v46  ;;  %v676_v48 = vcombine.high %v509_v34, %v655_v46  ;;  %v1021_v49 = vpop.f32.mrb[7].mxu1 }
 0x1d7   : > { %v683_v53 = vrot.slane %v675_v47, %v666_v45  ;;  %v690_v54 = vrot.slane %v676_v48, %v666_v45 }
 0x1d9   : > { %v691_v55 = vcombine.low %v667_v51, %v683_v53  ;;  %v708_v56 = vcombine.high %v674_v52, %v690_v54  ;;  %v707_v57 = vcombine.low %v674_v52, %v690_v54  ;;  %v692_v58 = vcombine.high %v667_v51, %v683_v53 }
 0x1db   : > { %v715_v59 = vrot.slane %v707_v57, %v698_v50  ;;  %v706_v60 = vrot.slane %v692_v58, %v698_v50  ;;  %v699_v61 = vrot.slane %v691_v55, %v698_v50  ;;  %v722_v2 = vrot.slane %v708_v56, %v698_v50 }
 0x1dd   : > { %740 = vrot.lane.b32.xlu1 %v715_v59, %s1166_s6  ;;  %732 = vrot.lane.b32.xlu0 %v706_v60, %s1167_s7  ;;  %v724_v62 = vcombine.high %v706_v60, %v1163_v12  ;;  %v723_v63 = vcombine.high %v699_v61, %v1163_v12  ;;  %v725_v1 = vcombine.high %v715_v59, %v1163_v12 }
 0x1de   : > { %v726_v4 = vcombine.high %v722_v2, %v1163_v12 }
 0x1e1   : > { %736 = vrot.lane.b32.xlu1 %v724_v62, %s1169_s8  ;;  %728 = vrot.lane.b32.xlu0 %v723_v63, %s1170_s9  ;;  %s1315_s8 = scalar_lea.hbm %s1362_s5, %s950_s25  ;;  %s856_s9 = scalar_lea.sflag [#allocation3], %s215_s17 }
 0x1e5   : > { %748 = vrot.lane.b32.xlu1 %v722_v2, %s1171_s10  ;;  %744 = vrot.lane.b32.xlu0 %v725_v1, %s1172_s11  ;;  %s1097_s10 = scalar_lea.vmem %s1317_s30, 32  ;;  %s1101_s11 = sshll.u32 %s1174_s22, 4  ;;  %s1102_s11 = int_to_ptr.vmem [resolvable:$false] %s1101_s11 }
 0x1e6   : > { %p1098_p11 = scmp.ne.s32.totalorder %s1317_s30, %s1097_s10  ;;  %s1103_s12 = scalar_lea.vmem %s1102_s11, 64 }
 0x1e7   : > { %p1104_p0 = scmp.lt.s32.totalorder %s1317_s30, %s1102_s11  ;;  %p1105_p1 = scmp.lt.s32.totalorder %s1103_s12, %s1097_s10 }
 0x1e8   : > { %p1099_p12 = pnand %p1098_p11, %p1243_p5 }
 0x1e9   : > { %752 = vrot.lane.b32.xlu0 %v726_v4, %s1173_s14  ;;  %772 = vperm.xlu1 %1095, %v769_v3   ;;  %p1106_p2 = por %p1105_p1, %p1104_p0 }
 0x1ea   : > { %p1100_p13 = pneg %p1099_p12 }
 0x1ec   : > { %p1107_p3 = pnand %p1106_p2, %p1100_p13 }
 0x24f   : > { %v741_v5 = vpop.permute.xlu1 %740  ;;  %v733_v6 = vpop.permute.xlu0 %732 }
 0x253   : > { %v737_v7 = vpop.permute.xlu1 %736  ;;  %v729_v8 = vpop.permute.xlu0 %728 }
 0x254   : > { %v756_v9 = vsel %vm755_vm2, %v699_v61, %v729_v8 }
 0x255   : > { %v757_v10 = vsel %vm233_vm0, %v756_v9, %v733_v6 }
 0x256   : > { %v759_v11 = vsel %vm758_vm3, %v757_v10, %v737_v7 }
 0x257   : > { %v761_v13 = vsel %vm760_vm4, %v759_v11, %v741_v5  ;;  %v745_v14 = vpop.permute.xlu0 %744  ;;  %v749_v12 = vpop.permute.xlu1 %748 }
 0x258   : > { %v763_v15 = vsel %vm762_vm5, %v761_v13, %v745_v14 }
 0x259   : > { %v765_v16 = vsel %vm764_vm6, %v763_v15, %v749_v12 }
 0x25b   : > { %v753_v17 = vpop.permute.xlu0 %752 }
 0x25c   : > { %v767_v19 = vsel %vm766_vm7, %v765_v16, %v753_v17 }
 0x25d   : > { %1023 = vmatpush3.msk.msra.mxu0 %vm779_vm8, %v767_v19 }
 0x25e   : > { %1025 = vmatmul.mubr.msk.f32.vlgmr.msra.gmra.mrb[8].mxu0 %vm775_vm9, %v768_v18 }
 0x268   : > { %v773_v20 = vpop.permute.xlu1 %772 }
 0x331   : > { %v849_v21 = vpop.f32.mrb[8].mxu0 }
 0x332   : > { %v850_v22 = vadd.f32 %v849_v21, %v773_v20  ;;  %v1026_v23 = vpop.f32.mrb[9].mxu0 }
 0x334   : > { %854 = vst.msk [vmem:[%s217_s26] sm:$0x3] %vm853_vm10, %v850_v22 }
 0x335   : > { %1110 = shalt.err (!%p1107_p3)
}
 0x336   : > { %s1111_s13 = scalar_lea.hbm %s1315_s8, 32  ;;  %s1115_s16 = scalar_lea.hbm %s1362_s5, 64 }
 0x337   : > { %p1112_p4 = scmp.ne.s32.totalorder %s1315_s8, %s1111_s13  ;;  %p1116_p9 = scmp.lt.u32.totalorder %s1315_s8, %s1362_s5 }
 0x338   : > { %p1117_p10 = scmp.lt.u32.totalorder %s1115_s16, %s1111_s13  ;;  %p1119_p12 = scmp.lt.u32.totalorder %s1111_s13, %s1315_s8 }
 0x339   : > { %p1113_p7 = pnand %p1112_p4, %p1243_p5 }
 0x33a   : > { %p1118_p11 = por %p1117_p10, %p1116_p9 }
 0x33b   : > { %p1114_p8 = pneg %p1113_p7 }
 0x33c   : > { %p1120_p13 = por %p1119_p12, %p1118_p11 }
 0x33e   : > { %p1121_p0 = pnand %p1120_p13, %p1114_p8 }
 0x340   : > { %1124 = shalt.err (!%p1121_p0)
}
 0x341   : > { %1043 = dma.vmem_to_hbm [thread:$0]  (%p1243_p5), %s1317_s30, 32, %s1315_s8, %s856_s9  }
 0x342 PF: > { %p1049_p1 = scmp.ge.s32.totalorder %s1159_s21, 2  ;;  %s881_s25 = sand.u32 1, %s1147_s18  }
 0x343   : > { %s882_s26 = scalar_lea.sflag [#allocation3], %s881_s25 }
 0x344   : > { %p1046_p2 = pnand %p1049_p1, %p1247_p6 }
 0x346   : > { %1142 = dma.done.wait (!%p1046_p2), %s882_s26, 32  }
 0x347   : > { %1144 = vsyncadd (!%p1046_p2), %s882_s26, 4294967264  ;;  %p15_p3 = scmp.ge.s32.totalorder %s1230_s24, 4   ;;  %s1365_s18 = smov %s1151_s19 }
 0x348   : > { %s1366_s19 = smov %s1155_s20  ;;  %s1367_s20 = smov %s1241_s27 }
 0x349   : > { %s1368_s21 = smov %s1230_s24  ;;  %17 = sbr.rel (!%p15_p3) target bundleno = 3 (0x3), region = 75 }
 0x350   :  { %887 = vsyncpa [#allocation3], 1 }
 0x351   :  { %889 = vsyncpa [#allocation3 + $0x1], 1 }

</bundles_post_ra>
